<compile_context>
chip_gen: v5e
topology: v5e:2x2
jax: 0.10.0
libtpu: 0.0.40
codegen_flags: <defaults>
</compile_context>

<pallas_src>
import math

import jax
import jax.numpy as jnp
from jax.experimental import pallas as pl
from jax.experimental.pallas import tpu as pltpu


def _identity_copy_kernel(x_ref, o_ref):
    # Whole hot path of IdentityBase.forward: o = x (bit-exact copy via VMEM).
    o_ref[...] = x_ref[...]


def _pick_lane_cols(total):
    """Largest multiple-of-128 divisor of `total` (capped for lane-density)."""
    for c in (2048, 1024, 512, 384, 256, 128):
        if total % c == 0:
            return c
    return None


def identity_base_forward(x):
    """Pallas equivalent of IdentityBase.forward(x) -> x (bit-exact copy)."""
    orig_shape = x.shape
    orig_dtype = x.dtype
    total = math.prod(orig_shape) if orig_shape else 1

    cols = _pick_lane_cols(total)
    if cols is None:
        # Irregular/tiny sizes (element count not a multiple of 128): fall back
        # to a single full-array block (block == array dims is always legal).
        x2d = x.reshape(1, total)
        out2d = pl.pallas_call(
            _identity_copy_kernel,
            out_shape=jax.ShapeDtypeStruct((1, total), orig_dtype),
            grid=(1,),
            in_specs=[pl.BlockSpec((1, total), lambda i: (0, 0))],
            out_specs=pl.BlockSpec((1, total), lambda i: (0, 0)),
            compiler_params=pltpu.CompilerParams(
                dimension_semantics=("arbitrary",)),
        )(x2d)
        return out2d.reshape(orig_shape)

    rows = total // cols
    itemsize = jnp.dtype(orig_dtype).itemsize

    # Target ~2 MiB per tile. With 1 input + 1 output, each double-buffered,
    # VMEM use is ~4x tile bytes (~8 MiB), which fits the default scoped VMEM
    # on v5e (16 MiB) as well as v6e/v7x (32 MiB) with headroom, while tiles
    # this size already sit on the ~85% HBM-roofline plateau.
    target_tile_bytes = 2 * 1024 * 1024
    tile_rows = max(8, (target_tile_bytes // (cols * itemsize)) // 8 * 8)
    if tile_rows >= rows:
        tile_rows = rows           # full extent: (8,128) rule trivially holds
        grid_rows = 1
    else:
        grid_rows = pl.cdiv(rows, tile_rows)

    x2d = x.reshape(rows, cols)

    out2d = pl.pallas_call(
        _identity_copy_kernel,
        out_shape=jax.ShapeDtypeStruct((rows, cols), orig_dtype),
        grid=(grid_rows,),
        in_specs=[pl.BlockSpec((tile_rows, cols), lambda i: (i, 0))],
        out_specs=pl.BlockSpec((tile_rows, cols), lambda i: (i, 0)),
        # Each tile maps to a distinct output block -> fully independent grid
        # axis; "parallel" lets v7x shard the copy across its 2 TensorCores.
        compiler_params=pltpu.CompilerParams(
            dimension_semantics=("parallel",)),
    )(x2d)

    # TODO(synk): since IdentityBase is a pure no-op, callers that can tolerate
    # aliasing should return `x` directly (zero HBM traffic beats any copy).
    return out2d.reshape(orig_shape)


if __name__ == "__main__":
    key = jax.random.PRNGKey(0)

    # Primary check: small NCHW input consistent with typical module use.
    x = jax.random.normal(key, (2, 4, 16, 16), dtype=jnp.float32)
    y = identity_base_forward(x)
    jax.block_until_ready(y)
    assert y.shape == x.shape
    assert y.dtype == x.dtype
    assert bool(jnp.array_equal(y, x))

    # Secondary check: a modest tensor that exercises the multi-tile path
    # (rows > tile_rows -> grid of several steps with pipelined DMAs).
    k2 = jax.random.PRNGKey(0)
    x2 = jax.random.normal(k2, (4, 16, 128, 128), dtype=jnp.float32)
    y2 = identity_base_forward(x2)
    jax.block_until_ready(y2)
    assert y2.shape == x2.shape
    assert y2.dtype == x2.dtype
    assert bool(jnp.array_equal(y2, x2))

    print("KERNEL_OK")
</pallas_src>

<mosaic_0001>
module attributes {stable_mosaic.version = 11 : i64} {
  func.func @_identity_copy_kernel(%arg0: i32, %arg1: memref<1x2048xf32, #tpu.memory_space<vmem>>, %arg2: memref<1x2048xf32, #tpu.memory_space<vmem>>) attributes {dimension_semantics = [#tpu.dimension_semantics<parallel>], iteration_bounds = array<i64: 1>, scalar_prefetch = 0 : i64, scratch_operands = 0 : i64, tpu.core_type = #tpu.core_type<tc>, window_params = [{transform_indices = @transform_0, window_bounds = array<i64: 1, 2048>}, {transform_indices = @transform_1, window_bounds = array<i64: 1, 2048>}]} {
    %c0 = arith.constant 0 : index
    %c0_0 = arith.constant 0 : index
    %0 = vector.load %arg1[%c0, %c0_0] : memref<1x2048xf32, #tpu.memory_space<vmem>>, vector<1x2048xf32>
    %c0_1 = arith.constant 0 : index
    %c0_2 = arith.constant 0 : index
    %1 = vector.load %arg2[%c0_1, %c0_2] : memref<1x2048xf32, #tpu.memory_space<vmem>>, vector<1x2048xf32>
    tpu.vector_store %arg2[%c0_1, %c0_2], %0 {strides = array<i32>} : memref<1x2048xf32, #tpu.memory_space<vmem>>, vector<1x2048xf32>,
    return
  }
  func.func @transform_0(%arg0: i32) -> (i32, i32) {
    %c0_i32 = arith.constant 0 : i32
    %c0_i32_0 = arith.constant 0 : i32
    return %arg0, %c0_i32 : i32, i32
  }
  func.func @transform_1(%arg0: i32) -> (i32, i32) {
    %c0_i32 = arith.constant 0 : i32
    %c0_i32_0 = arith.constant 0 : i32
    return %arg0, %c0_i32 : i32, i32
  }
}

</mosaic_0001>

<bundles_post_ra>
// kernel: tpu_custom_call.1
= control target key start
LH: loop header
LB: loop body
LE: loop exit
PB: predicated region body
PF: predicated region fallthrough
CT: control target
= control target key end

     0   :  { %6 = vsyncpa [#allocation3], 0  ;;  %s116_s0 = inlined_call_operand.hbm [shape: f32[1,2048], index: 0, kind: input, shape index: {}]   ;;  %s117_s1 = inlined_call_operand.hbm [shape: f32[1,2048], index: 1, kind: output, shape index: {}]  }
   0x1   :  { %7 = vsyncpa [#allocation4], 0  ;;  %s13_s8 = sshll.u32 %s116_s0, 4  ;;  %s98_s9 = smov [#allocation2]   ;;  %s14_s8 = int_to_ptr.hbm [resolvable:$true] %s13_s8 }
   0x2   :  { %s15_s10 = sshll.u32 %s98_s9, 4  ;;  %s16_s10 = int_to_ptr.vmem [resolvable:$true] %s15_s10 }
   0x3   :  { %18 = dma.hbm_to_vmem [thread:$0]  %s14_s8, 256, %s16_s10, [#allocation3]  }
   0x4   :  { %94 = dma.done.wait [#allocation3], 256  }
   0x5   :  { %95 = vsyncadd [#allocation3], 4294967040  ;;  %s99_s11 = smov [#allocation5]   ;;  %s34_s15 = sshll.u32 %s117_s1, 4  ;;  %v23_v0 = vld [vmem:[#allocation2] sm:$0xff]  ;;  %v24_v1 = vld [vmem:[#allocation2 + $0x8] sm:$0xff]  ;;  %s35_s15 = int_to_ptr.hbm [resolvable:$true] %s34_s15 }
   0x6   :  { %s32_s12 = sshll.u32 %s99_s11, 4  ;;  %25 = vst [vmem:[#allocation5] sm:$0xff] %v23_v0  ;;  %s33_s12 = int_to_ptr.vmem [resolvable:$true] %s32_s12 }
   0x7   :  { %26 = vst [vmem:[#allocation5 + $0x8] sm:$0xff] %v24_v1 }
   0x8   :  { %37 = dma.vmem_to_hbm [thread:$0]  %s33_s12, 256, %s35_s15, [#allocation4]  }
   0x9   :  { %96 = dma.done.wait [#allocation4], 256  }
   0xa   :  { %97 = vsyncadd [#allocation4], 4294967040 }
   0xb   :  { %42 = vsyncpa [#allocation3], 1 }
   0xc   :  { %43 = vsyncpa [#allocation4], 1 }

</bundles_post_ra>
